<compile_context>
chip_gen: v5e
topology: v5e:2x2
jax: 0.10.0
libtpu: 0.0.40
codegen_flags: <defaults>
</compile_context>

<pallas_src>
import jax
import jax.numpy as jnp
from jax.experimental import pallas as pl
from jax.experimental.pallas import tpu as pltpu


# Below this size the pallas_call fixed overhead (custom-call dispatch,
# ~0.35 us/grid step) dominates; XLA / plain identity is already optimal.
_PALLAS_CUTOFF_BYTES = 4 * 1024 * 1024
# Only split the DMA into two concurrent streams (one per v7x TensorCore)
# when the copy is big enough for a second stream to matter.
_SPLIT_CUTOFF_BYTES = 32 * 1024 * 1024


def diffusion_network_forward(G):
    """Zero-cost forward, exactly matching `return self.G`."""
    return G


def _make_dma_copy_kernel(rows_per_slice):
    """HBM->HBM copy of `rows_per_slice` rows per grid step (no VMEM staging)."""

    def kernel(g_hbm, o_hbm, sem):
        start = pl.program_id(0) * rows_per_slice
        cp = pltpu.make_async_copy(
            g_hbm.at[pl.ds(start, rows_per_slice)],
            o_hbm.at[pl.ds(start, rows_per_slice)],
            sem,
        )
        cp.start()
        cp.wait()

    return kernel


def diffusion_network_forward_pallas(G, *, force_pallas=False):
    """Materialize G into a fresh buffer.

    Small G (below a few MiB): just return G (identity) — Pallas overhead
    would dominate.  Large G: single direct HBM->HBM DMA; on v7x-sized
    inputs the copy is split into two row-halves so both TensorCores can
    issue concurrent DMA streams.
    """
    d, m = G.shape
    n_bytes = d * m * G.dtype.itemsize

    if not force_pallas and n_bytes < _PALLAS_CUTOFF_BYTES:
        # Identity forward; no kernel, no copy.
        return jnp.asarray(G)

    if n_bytes >= _SPLIT_CUTOFF_BYTES and d % 2 == 0:
        num_slices = 2  # one DMA stream per v7x TensorCore; inert on v5e/v6e
    else:
        num_slices = 1
    rows_per_slice = d // num_slices

    out = pl.pallas_call(
        _make_dma_copy_kernel(rows_per_slice),
        out_shape=jax.ShapeDtypeStruct((d, m), G.dtype),
        grid=(num_slices,),
        in_specs=[pl.BlockSpec(memory_space=pl.ANY)],
        out_specs=pl.BlockSpec(memory_space=pl.ANY),
        scratch_shapes=[pltpu.SemaphoreType.DMA(())],
        compiler_params=pltpu.CompilerParams(
            dimension_semantics=("parallel",),
        ),
        cost_estimate=pl.CostEstimate(
            flops=0, transcendentals=0, bytes_accessed=2 * n_bytes),
    )(G)
    return out


def init_diffusion_network_params(key, d, m=1, init_scale=0.01):
    """Deterministic parameter init matching: G = init_scale * randn(d, m)."""
    return init_scale * jax.random.normal(key, (d, m), dtype=jnp.float32)


if __name__ == "__main__":
    # Small shapes consistent with the module: d=16, m=8.
    d, m = 16, 8
    key = jax.random.PRNGKey(0)
    G = init_diffusion_network_params(key, d, m, init_scale=0.01)

    # Optimal path: forward() is literally `return G`.
    out_fast = diffusion_network_forward(G)

    # Pallas path (direct HBM->HBM DMA), forced so the kernel is exercised
    # even though this G is tiny (normally the cutoff returns G directly).
    out_pallas = jax.block_until_ready(
        diffusion_network_forward_pallas(G, force_pallas=True))

    assert out_pallas.shape == (d, m)
    assert out_pallas.dtype == G.dtype
    assert bool(jnp.array_equal(out_pallas, G))
    assert bool(jnp.array_equal(out_fast, G))

    print("KERNEL_OK")
</pallas_src>

<mosaic_0001>
module attributes {stable_mosaic.version = 11 : i64} {
  func.func @kernel(%arg0: i32, %arg1: memref<16x8xf32, #tpu.memory_space<any>>, %arg2: memref<16x8xf32, #tpu.memory_space<any>>, %arg3: memref<!tpu.dma_semaphore, #tpu.memory_space<semaphore_mem>>) attributes {dimension_semantics = [#tpu.dimension_semantics<parallel>], iteration_bounds = array<i64: 1>, scalar_prefetch = 0 : i64, scratch_operands = 1 : i64, tpu.core_type = #tpu.core_type<tc>, window_params = [{}, {}]} {
    %c16_i32 = arith.constant 16 : i32
    %0 = arith.muli %arg0, %c16_i32 : i32
    %c0_i32 = arith.constant 0 : i32
    %1 = tpu.memref_slice %arg1[%0, %c0_i32] : memref<16x8xf32, #tpu.memory_space<any>> -> memref<16x8xf32, #tpu.memory_space<any>>
    %c0_i32_0 = arith.constant 0 : i32
    %2 = tpu.memref_slice %arg2[%0, %c0_i32_0] : memref<16x8xf32, #tpu.memory_space<any>> -> memref<16x8xf32, #tpu.memory_space<any>>
    tpu.enqueue_dma source(%1 : memref<16x8xf32, #tpu.memory_space<any>>) target(%2 : memref<16x8xf32, #tpu.memory_space<any>>) target_semaphore(%arg3 : memref<!tpu.dma_semaphore, #tpu.memory_space<semaphore_mem>>)
    %c0_i32_1 = arith.constant 0 : i32
    %3 = tpu.memref_slice %arg1[%0, %c0_i32_1] : memref<16x8xf32, #tpu.memory_space<any>> -> memref<16x8xf32, #tpu.memory_space<any>>
    %c0_i32_2 = arith.constant 0 : i32
    %4 = tpu.memref_slice %arg2[%0, %c0_i32_2] : memref<16x8xf32, #tpu.memory_space<any>> -> memref<16x8xf32, #tpu.memory_space<any>>
    tpu.wait_dma2 semaphore(%arg3 : memref<!tpu.dma_semaphore, #tpu.memory_space<semaphore_mem>>) src(%3 : memref<16x8xf32, #tpu.memory_space<any>>) dst(%4 : memref<16x8xf32, #tpu.memory_space<any>>)
    return
  }
}

</mosaic_0001>

<bundles_post_ra>
// kernel: tpu_custom_call.1
= control target key start
LH: loop header
LB: loop body
LE: loop exit
PB: predicated region body
PF: predicated region fallthrough
CT: control target
= control target key end

     0   :  { %s67_s0 = inlined_call_operand.vmem [shape: f32[16,8], index: 0, kind: input, shape index: {}]   ;;  %s68_s1 = inlined_call_operand.vmem [shape: f32[16,8], index: 1, kind: output, shape index: {}]  }
   0x1   :  { %v19_v0 = vld [vmem:[%s67_s0] sm:$0xff]  ;;  %v21_v1 = vld [vmem:[%s67_s0 + $0x8] sm:$0xff] }
   0x2   :  { %20 = vst [vmem:[%s68_s1] sm:$0xff] %v19_v0 }
   0x3   :  { %22 = vst [vmem:[%s68_s1 + $0x8] sm:$0xff] %v21_v1 }
   0x4   :  { %28 = vsyncadd [#allocation2], 256 }
   0x5   :  { %43 = dma.done.wait [#allocation2], 256 }
   0x6   :  { %44 = vsyncadd [#allocation2], 4294967040 }
   0x7   :  { %32 = vsyncmov [#allocation2] }
   0xa   :  { %s33_s14 = vpop.sfrf %32 }
   0xb   :  { %p42_p0 = scmp.ne.s32.totalorder %s33_s14, 0 }
   0xd   :  { %37 = shalt.err (%p42_p0)  }

</bundles_post_ra>
